<compile_context>
chip_gen: v6e
topology: v6e:2x2x1
jax: 0.10.0
libtpu: 0.0.40
codegen_flags: <defaults>
</compile_context>

<pallas_src>
import jax
import jax.numpy as jnp
from jax.experimental import pallas as pl
from jax.experimental.pallas import tpu as pltpu

IN_FEATURES = 17
HIDDEN1 = 64
HIDDEN2 = 64
HIDDEN3 = 64
OUT_FEATURES = 2
NORM_EPS = 1e-12            # torch.nn.functional.normalize default eps

LANE = 128                  # TPU lane width (last-dim tiling unit)
DEFAULT_BLOCK_BATCH = 8192  # batch rows per grid step (safe on all generations)
VMEM_LIMIT_BYTES = 40 * 1024 * 1024   # headroom even on v7x's 64 MiB VMEM


def _round_up(n, m):
    return (n + m - 1) // m * m


def _mlp_kernel(x_ref, pw1_ref, pw2_ref, pw3_ref, pw4_ref, o_ref):
    """One batch tile: x_ref is (TB, 17) natural layout; o_ref is (2, TB)."""
    x = x_ref[...]                                            # (TB, 17)

    # Layer 1: fused transpose — contract the shared 17-dim on the MXU,
    # producing (64, TB) directly (batch stays on the lane axis).
    w1 = pw1_ref[:, :IN_FEATURES]                             # (64, 17)
    b1 = pw1_ref[:, IN_FEATURES:]                             # (64, 1)
    h = jax.lax.dot_general(w1, x, (((1,), (1,)), ((), ())),
                            preferred_element_type=jnp.float32)
    h = jnp.maximum(h + b1, 0.0)                              # (64, TB)

    w2 = pw2_ref[:, :HIDDEN1]
    b2 = pw2_ref[:, HIDDEN1:]
    h = jnp.maximum(jnp.dot(w2, h, preferred_element_type=jnp.float32) + b2, 0.0)

    w3 = pw3_ref[:, :HIDDEN2]
    b3 = pw3_ref[:, HIDDEN2:]
    h = jnp.maximum(jnp.dot(w3, h, preferred_element_type=jnp.float32) + b3, 0.0)

    w4 = pw4_ref[:, :HIDDEN3]
    b4 = pw4_ref[:, HIDDEN3:]
    y = jnp.dot(w4, h, preferred_element_type=jnp.float32) + b4   # (2, TB)

    # F.normalize(y, dim=features): y / max(||y||, eps) == y * rsqrt(max(sumsq, eps^2))
    sumsq = jnp.sum(y * y, axis=0, keepdims=True)             # (1, TB): 2-row VPU reduce
    inv_norm = jax.lax.rsqrt(jnp.maximum(sumsq, NORM_EPS * NORM_EPS))  # EUP slot
    o_ref[...] = y * inv_norm


def _pick_tile(batch, block_batch):
    """Batch tile: multiple of 128 lanes, capped so v7x gets >= 2 grid steps."""
    padded_min = _round_up(batch, LANE)
    tb = min(block_batch, padded_min)
    if padded_min >= 2 * LANE:
        # Force at least 2 grid steps so the "parallel" axis shards across
        # both TensorCores on v7x (no-op on single-TC v5e/v6e).
        tb = min(tb, _round_up(pl.cdiv(batch, 2), LANE))
    return tb


def simple_dnn_forward_t(x, params, *, block_batch=DEFAULT_BLOCK_BATCH):
    """x: (B, 17) float32.  Returns lane-dense (2, B) output (preferred layout)."""
    batch = x.shape[0]
    tb = _pick_tile(batch, block_batch)
    steps = pl.cdiv(batch, tb)
    padded = steps * tb

    packed = (params["pw1"], params["pw2"], params["pw3"], params["pw4"])

    # x streams in natural (TB, 17) blocks (ragged tail reads unspecified OOB
    # rows — harmless, see header).  Packed weights are full blocks with a
    # constant index_map so they are DMA'd once and stay VMEM-resident.
    in_specs = [pl.BlockSpec((tb, IN_FEATURES), lambda i: (i, 0))]
    in_specs += [pl.BlockSpec(p.shape, lambda i: (0, 0)) for p in packed]
    out_specs = pl.BlockSpec((OUT_FEATURES, tb), lambda i: (0, i))

    out_t = pl.pallas_call(
        _mlp_kernel,
        out_shape=jax.ShapeDtypeStruct((OUT_FEATURES, padded), jnp.float32),
        grid=(steps,),
        in_specs=in_specs,
        out_specs=out_specs,
        compiler_params=pltpu.CompilerParams(
            dimension_semantics=("parallel",),      # megacore sharding on v7x
            vmem_limit_bytes=VMEM_LIMIT_BYTES,
        ),
    )(x, *packed)

    if padded != batch:
        out_t = out_t[:, :batch]      # drop the garbage tail columns (tiny slice)
    return out_t                      # (2, B), batch on the lane axis


def simple_dnn_forward(x, params, *, block_batch=DEFAULT_BLOCK_BATCH):
    """PyTorch-compatible (B, 2) output.  Prefer simple_dnn_forward_t downstream."""
    return jnp.transpose(simple_dnn_forward_t(x, params, block_batch=block_batch))


def init_params(key):
    """PyTorch nn.Linear-style init; each layer packed as [W | b] -> (out, in+1)."""
    shapes = [
        (HIDDEN1, IN_FEATURES),
        (HIDDEN2, HIDDEN1),
        (HIDDEN3, HIDDEN2),
        (OUT_FEATURES, HIDDEN3),
    ]
    params = {}
    for i, (fan_out, fan_in) in enumerate(shapes, start=1):
        key, kw, kb = jax.random.split(key, 3)
        bound = 1.0 / (fan_in ** 0.5)          # PyTorch Linear default uniform bound
        w = jax.random.uniform(kw, (fan_out, fan_in), jnp.float32,
                               minval=-bound, maxval=bound)
        b = jax.random.uniform(kb, (fan_out, 1), jnp.float32,
                               minval=-bound, maxval=bound)
        params[f"pw{i}"] = jnp.concatenate([w, b], axis=1)
    return params


def reference_forward(x, params):
    """Pure-JAX reference mirroring the PyTorch module."""
    def unpack(p, fan_in):
        return p[:, :fan_in], p[:, fan_in:]
    w1, b1 = unpack(params["pw1"], IN_FEATURES)
    w2, b2 = unpack(params["pw2"], HIDDEN1)
    w3, b3 = unpack(params["pw3"], HIDDEN2)
    w4, b4 = unpack(params["pw4"], HIDDEN3)
    h = jnp.maximum(x @ w1.T + b1.T, 0.0)
    h = jnp.maximum(h @ w2.T + b2.T, 0.0)
    h = jnp.maximum(h @ w3.T + b3.T, 0.0)
    y = h @ w4.T + b4.T
    norm = jnp.sqrt(jnp.sum(y * y, axis=1, keepdims=True))
    return y / jnp.maximum(norm, NORM_EPS)


if __name__ == "__main__":
    key = jax.random.PRNGKey(0)
    key, kx = jax.random.split(key)
    params = init_params(key)

    fwd = jax.jit(simple_dnn_forward, static_argnames=("block_batch",))

    # Small demo batch: single grid step, ragged tail (8 valid rows of a 128-row tile).
    batch = 8
    x = jax.random.normal(kx, (batch, IN_FEATURES), jnp.float32)
    out = jax.block_until_ready(fwd(x, params))
    ref = reference_forward(x, params)
    assert out.shape == (batch, OUT_FEATURES)
    assert jnp.allclose(out, ref, atol=2e-5, rtol=2e-5), "mismatch vs reference (batch=8)"

    # Batch 300: the >=2-step rule gives tb=256 -> 2 grid steps + ragged tail.
    key, kx2 = jax.random.split(key)
    batch2 = 300
    x2 = jax.random.normal(kx2, (batch2, IN_FEATURES), jnp.float32)
    out2 = jax.block_until_ready(fwd(x2, params))
    ref2 = reference_forward(x2, params)
    assert out2.shape == (batch2, OUT_FEATURES)
    assert jnp.allclose(out2, ref2, atol=2e-5, rtol=2e-5), "mismatch vs reference (batch=300)"

    # Explicit small tile: 3 grid steps, exercises multi-step streaming + tail handling.
    out3 = jax.block_until_ready(fwd(x2, params, block_batch=128))
    assert jnp.allclose(out3, ref2, atol=2e-5, rtol=2e-5), "mismatch vs reference (tb=128)"

    print("KERNEL_OK")
</pallas_src>

<mosaic_0001>
module attributes {stable_mosaic.version = 11 : i64} {
  func.func @_mlp_kernel(%arg0: i32, %arg1: memref<128x17xf32, #tpu.memory_space<vmem>>, %arg2: memref<64x18xf32, #tpu.memory_space<vmem>>, %arg3: memref<64x65xf32, #tpu.memory_space<vmem>>, %arg4: memref<64x65xf32, #tpu.memory_space<vmem>>, %arg5: memref<2x65xf32, #tpu.memory_space<vmem>>, %arg6: memref<2x128xf32, #tpu.memory_space<vmem>>) attributes {dimension_semantics = [#tpu.dimension_semantics<parallel>], iteration_bounds = array<i64: 1>, scalar_prefetch = 0 : i64, scratch_operands = 0 : i64, tpu.core_type = #tpu.core_type<tc>, window_params = [{transform_indices = @transform_0, window_bounds = array<i64: 128, 17>}, {pipeline_mode = #tpu.pipeline_mode<synchronous>, transform_indices = @transform_1, window_bounds = array<i64: 64, 18>}, {pipeline_mode = #tpu.pipeline_mode<synchronous>, transform_indices = @transform_2, window_bounds = array<i64: 64, 65>}, {pipeline_mode = #tpu.pipeline_mode<synchronous>, transform_indices = @transform_3, window_bounds = array<i64: 64, 65>}, {pipeline_mode = #tpu.pipeline_mode<synchronous>, transform_indices = @transform_4, window_bounds = array<i64: 2, 65>}, {transform_indices = @transform_5, window_bounds = array<i64: 2, 128>}]} {
    %c0 = arith.constant 0 : index
    %c0_0 = arith.constant 0 : index
    %0 = vector.load %arg1[%c0, %c0_0] : memref<128x17xf32, #tpu.memory_space<vmem>>, vector<128x17xf32>
    %c0_1 = arith.constant 0 : index
    %c0_2 = arith.constant 0 : index
    %1 = vector.load %arg2[%c0_1, %c0_2] : memref<64x18xf32, #tpu.memory_space<vmem>>, vector<64x17xf32>
    %c0_3 = arith.constant 0 : index
    %c17 = arith.constant 17 : index
    %2 = vector.load %arg2[%c0_3, %c17] : memref<64x18xf32, #tpu.memory_space<vmem>>, vector<64x1xf32>
    %cst = arith.constant dense<0.000000e+00> : vector<64x128xf32>
    %3 = tpu.matmul %1, %0, %cst {dimension_numbers = #tpu.dot_dimension_numbers<[1], [1], [0], [0], [0, 0, 1, 0], [], []>} : vector<64x17xf32>, vector<128x17xf32>, vector<64x128xf32> -> vector<64x128xf32>
    %4 = vector.broadcast %2 : vector<64x1xf32> to vector<64x128xf32>
    %5 = arith.addf %3, %4 : vector<64x128xf32>
    %cst_4 = arith.constant 0.000000e+00 : f32
    %6 = vector.broadcast %cst_4 : f32 to vector<64x128xf32>
    %7 = arith.maximumf %5, %6 : vector<64x128xf32>
    %c0_5 = arith.constant 0 : index
    %c0_6 = arith.constant 0 : index
    %8 = vector.load %arg3[%c0_5, %c0_6] : memref<64x65xf32, #tpu.memory_space<vmem>>, vector<64x64xf32>
    %c0_7 = arith.constant 0 : index
    %c64 = arith.constant 64 : index
    %9 = vector.load %arg3[%c0_7, %c64] : memref<64x65xf32, #tpu.memory_space<vmem>>, vector<64x1xf32>
    %cst_8 = arith.constant dense<0.000000e+00> : vector<64x128xf32>
    %10 = tpu.matmul %8, %7, %cst_8 {dimension_numbers = #tpu.dot_dimension_numbers<[1], [0], [0], [1], [0, 0, 1, 1], [], []>} : vector<64x64xf32>, vector<64x128xf32>, vector<64x128xf32> -> vector<64x128xf32>
    %11 = vector.broadcast %9 : vector<64x1xf32> to vector<64x128xf32>
    %12 = arith.addf %10, %11 : vector<64x128xf32>
    %cst_9 = arith.constant 0.000000e+00 : f32
    %13 = vector.broadcast %cst_9 : f32 to vector<64x128xf32>
    %14 = arith.maximumf %12, %13 : vector<64x128xf32>
    %c0_10 = arith.constant 0 : index
    %c0_11 = arith.constant 0 : index
    %15 = vector.load %arg4[%c0_10, %c0_11] : memref<64x65xf32, #tpu.memory_space<vmem>>, vector<64x64xf32>
    %c0_12 = arith.constant 0 : index
    %c64_13 = arith.constant 64 : index
    %16 = vector.load %arg4[%c0_12, %c64_13] : memref<64x65xf32, #tpu.memory_space<vmem>>, vector<64x1xf32>
    %cst_14 = arith.constant dense<0.000000e+00> : vector<64x128xf32>
    %17 = tpu.matmul %15, %14, %cst_14 {dimension_numbers = #tpu.dot_dimension_numbers<[1], [0], [0], [1], [0, 0, 1, 1], [], []>} : vector<64x64xf32>, vector<64x128xf32>, vector<64x128xf32> -> vector<64x128xf32>
    %18 = vector.broadcast %16 : vector<64x1xf32> to vector<64x128xf32>
    %19 = arith.addf %17, %18 : vector<64x128xf32>
    %cst_15 = arith.constant 0.000000e+00 : f32
    %20 = vector.broadcast %cst_15 : f32 to vector<64x128xf32>
    %21 = arith.maximumf %19, %20 : vector<64x128xf32>
    %c0_16 = arith.constant 0 : index
    %c0_17 = arith.constant 0 : index
    %22 = vector.load %arg5[%c0_16, %c0_17] : memref<2x65xf32, #tpu.memory_space<vmem>>, vector<2x64xf32>
    %c0_18 = arith.constant 0 : index
    %c64_19 = arith.constant 64 : index
    %23 = vector.load %arg5[%c0_18, %c64_19] : memref<2x65xf32, #tpu.memory_space<vmem>>, vector<2x1xf32>
    %cst_20 = arith.constant dense<0.000000e+00> : vector<2x128xf32>
    %24 = tpu.matmul %22, %21, %cst_20 {dimension_numbers = #tpu.dot_dimension_numbers<[1], [0], [0], [1], [0, 0, 1, 1], [], []>} : vector<2x64xf32>, vector<64x128xf32>, vector<2x128xf32> -> vector<2x128xf32>
    %25 = vector.broadcast %23 : vector<2x1xf32> to vector<2x128xf32>
    %26 = arith.addf %24, %25 : vector<2x128xf32>
    %27 = arith.mulf %26, %26 : vector<2x128xf32>
    %cst_21 = arith.constant dense<0.000000e+00> : vector<128xf32>
    %28 = vector.multi_reduction <add>, %27, %cst_21 [0] : vector<2x128xf32> to vector<128xf32>
    %29 = vector.shape_cast %28 : vector<128xf32> to vector<1x128xf32>
    %cst_22 = arith.constant 1.000000e-24 : f32
    %30 = vector.broadcast %cst_22 : f32 to vector<1x128xf32>
    %31 = arith.maximumf %29, %30 : vector<1x128xf32>
    %32 = math.rsqrt %31 : vector<1x128xf32>
    %33 = vector.broadcast %32 : vector<1x128xf32> to vector<2x128xf32>
    %34 = arith.mulf %26, %33 : vector<2x128xf32>
    %c0_23 = arith.constant 0 : index
    %c0_24 = arith.constant 0 : index
    %35 = vector.load %arg6[%c0_23, %c0_24] : memref<2x128xf32, #tpu.memory_space<vmem>>, vector<2x128xf32>
    tpu.vector_store %arg6[%c0_23, %c0_24], %34 {strides = array<i32>} : memref<2x128xf32, #tpu.memory_space<vmem>>, vector<2x128xf32>,
    return
  }
  func.func @transform_0(%arg0: i32) -> (i32, i32) {
    %c0_i32 = arith.constant 0 : i32
    %c0_i32_0 = arith.constant 0 : i32
    return %arg0, %c0_i32 : i32, i32
  }
  func.func @transform_1(%arg0: i32) -> (i32, i32) {
    %c0_i32 = arith.constant 0 : i32
    %c0_i32_0 = arith.constant 0 : i32
    %c0_i32_1 = arith.constant 0 : i32
    return %c0_i32, %c0_i32_0 : i32, i32
  }
  func.func @transform_2(%arg0: i32) -> (i32, i32) {
    %c0_i32 = arith.constant 0 : i32
    %c0_i32_0 = arith.constant 0 : i32
    %c0_i32_1 = arith.constant 0 : i32
    return %c0_i32, %c0_i32_0 : i32, i32
  }
  func.func @transform_3(%arg0: i32) -> (i32, i32) {
    %c0_i32 = arith.constant 0 : i32
    %c0_i32_0 = arith.constant 0 : i32
    %c0_i32_1 = arith.constant 0 : i32
    return %c0_i32, %c0_i32_0 : i32, i32
  }
  func.func @transform_4(%arg0: i32) -> (i32, i32) {
    %c0_i32 = arith.constant 0 : i32
    %c0_i32_0 = arith.constant 0 : i32
    %c0_i32_1 = arith.constant 0 : i32
    return %c0_i32, %c0_i32_0 : i32, i32
  }
  func.func @transform_5(%arg0: i32) -> (i32, i32) {
    %c0_i32 = arith.constant 0 : i32
    %c0_i32_0 = arith.constant 0 : i32
    return %c0_i32, %arg0 : i32, i32
  }
}

</mosaic_0001>

<bundles_post_ra>
// kernel: simple_dnn_forward.1
= control target key start
LH: loop header
LB: loop body
LE: loop exit
PB: predicated region body
PF: predicated region fallthrough
CT: control target
= control target key end

     0   :  { %10 = vsyncpa [#allocation3], 0  ;;  %s987_s18 = smov [#allocation2]   ;;  %s1246_s0 = inlined_call_operand.vmem [shape: f32[8,17], index: 0, kind: input, shape index: {}]   ;;  %s1247_s1 = inlined_call_operand.vmem [shape: f32[64,18], index: 1, kind: input, shape index: {}]   ;;  %s1248_s2 = inlined_call_operand.vmem [shape: f32[64,65], index: 2, kind: input, shape index: {}]   ;;  %s1249_s3 = inlined_call_operand.hbm [shape: f32[64,65], index: 3, kind: input, shape index: {}]   ;;  %s1250_s4 = inlined_call_operand.vmem [shape: f32[2,65], index: 4, kind: input, shape index: {}]   ;;  %s1251_s5 = inlined_call_operand.vmem [shape: f32[2,128], index: 5, kind: output, shape index: {}]  }
   0x1   :  { %s22_s19 = sshll.u32 %s987_s18, 4  ;;  %s23_s19 = int_to_ptr.vmem [resolvable:$true] %s22_s19 }
   0x2   :  { %s973_s20 = scalar_lea.vmem %s23_s19, 1024  ;;  %p978_p1 = scmp.lt.s32.totalorder %s23_s19, %s23_s19 }
   0x3   :  { %p974_p0 = scmp.ne.s32.totalorder %s23_s19, %s973_s20  ;;  %p979_p2 = scmp.lt.s32.totalorder %s973_s20, %s973_s20 }
   0x5   :  { %p980_p3 = por %p979_p2, %p978_p1 }
   0x7   :  { %p981_p4 = pnand %p980_p3, %p974_p0 }
   0x9   :  { %984 = shalt.err (!%p981_p4)
}
   0xa   :  { %s988_s21 = smov 128   ;;  %s989_s22 = smov 8  }
   0xb   :  { %28 = dma.hbm_to_vmem [thread:$0]  %s1249_s3, 1024, %s23_s19, [#allocation3], %s988_s21, %s988_s21, %s989_s22  }
   0xc   :  { %985 = dma.done.wait [#allocation3], 1024  }
   0xd   :  { %986 = vsyncadd [#allocation3], 4294966272  ;;  %v990_v0 = vmov 17   ;;  %vm98_vm0 = vcmask 138240   ;;  %v49_v1 = vld [vmem:[%s1246_s0 + $0x78] sm:$0xff]  ;;  %v48_v2 = vld [vmem:[%s1246_s0 + $0x70] sm:$0xff] }
   0xe   :  { %959 = vset.pattern.permute.xlu0 %v990_v0  ;;  %960 = vset.pattern.permute.xlu1 %v990_v0  ;;  %v47_v3 = vld [vmem:[%s1246_s0 + $0x68] sm:$0xff]  ;;  %v50_v4 = vld [vmem:[%s1247_s1] sm:$0xff]  ;;  %v57_v6 = vld [vmem:[%s1247_s1 + $0x38] sm:$0xff]  ;;  %vm324_vm1 = vcmask 523264   ;;  %v991_v28 = vmov 64   ;;  %vm993_vm2 = vmmov 0  }
   0xf   :  { %833 = vmatprep.subr.msk.mxu0 %vm98_vm0, %v49_v1  ;;  %865 = vmatprep.mubr.msk.f32.mxu0 %vm98_vm0, %v50_v4  ;;  %v55_v5 = vld [vmem:[%s1247_s1 + $0x28] sm:$0xff]  ;;  %v46_v7 = vld [vmem:[%s1246_s0 + $0x60] sm:$0xff]  ;;  %v56_v9 = vld [vmem:[%s1247_s1 + $0x30] sm:$0xff]  ;;  %vm710_vm3 = vcmask 1041408  }
  0x10   :  { %834 = vmatpush3.xpose.msk.msra.mxu0 %vm98_vm0, %v49_v1  ;;  %95 = vperm.xlu0 %959, %v57_v6   ;;  %v54_v8 = vld [vmem:[%s1247_s1 + $0x20] sm:$0xff]  ;;  %v45_v10 = vld [vmem:[%s1246_s0 + $0x58] sm:$0xff]  ;;  %v52_v11 = vld [vmem:[%s1247_s1 + $0x10] sm:$0xff] }
  0x11   :  { %835 = vmatprep.subr.msk.mxu0 %vm98_vm0, %v48_v2  ;;  %85 = vperm.xlu1 %960, %v55_v5   ;;  %v53_v12 = vld [vmem:[%s1247_s1 + $0x18] sm:$0xff]  ;;  %v44_v13 = vld [vmem:[%s1246_s0 + $0x50] sm:$0xff]  ;;  %v51_v14 = vld [vmem:[%s1247_s1 + $0x8] sm:$0xff] }
  0x12   :  { %v43_v15 = vld [vmem:[%s1246_s0 + $0x48] sm:$0xff]  ;;  %v42_v16 = vld [vmem:[%s1246_s0 + $0x40] sm:$0xff]  ;;  %v41_v17 = vld [vmem:[%s1246_s0 + $0x38] sm:$0xff] }
  0x13   :  { %v40_v18 = vld [vmem:[%s1246_s0 + $0x30] sm:$0xff]  ;;  %v39_v19 = vld [vmem:[%s1246_s0 + $0x28] sm:$0xff]  ;;  %v38_v20 = vld [vmem:[%s1246_s0 + $0x20] sm:$0xff] }
  0x14   :  { %836 = vmatpush3.xpose.msk.msra.mxu0 %vm98_vm0, %v48_v2  ;;  %90 = vperm.xlu0 %959, %v56_v9   ;;  %v37_v21 = vld [vmem:[%s1246_s0 + $0x18] sm:$0xff]  ;;  %v36_v22 = vld [vmem:[%s1246_s0 + $0x10] sm:$0xff]  ;;  %v35_v23 = vld [vmem:[%s1246_s0 + $0x8] sm:$0xff] }
  0x15   :  { %837 = vmatprep.subr.msk.mxu0 %vm98_vm0, %v47_v3  ;;  %80 = vperm.xlu1 %960, %v54_v8   ;;  %v34_v24 = vld [vmem:[%s1246_s0] sm:$0xff]  ;;  %v1146_v26 = vld [vmem:[%s1248_s2 + $0x30] sm:$0xff]  ;;  %v1151_v27 = vld [vmem:[%s1248_s2 + $0x38] sm:$0xff] }
  0x16   :  { %v276_v25 = vld [vmem:[%s1248_s2] sm:$0xff]  ;;  %v1163_v30 = vld [vmem:[%s1248_s2 + $0x28] sm:$0xff]  ;;  %v1170_v31 = vld [vmem:[%s1248_s2 + $0x10] sm:$0xff] }
  0x17   :  { %893 = vmatprep.mubr.msk.f32.mxu1 %vm324_vm1, %v276_v25  ;;  %v1158_v29 = vld [vmem:[%s1248_s2 + $0x20] sm:$0xff]  ;;  %v1175_v32 = vld [vmem:[%s1248_s2 + $0x18] sm:$0xff]  ;;  %v1182_v33 = vld [vmem:[%s1248_s2 + $0x8] sm:$0xff] }
  0x18   :  { %838 = vmatpush3.xpose.msk.msra.mxu0 %vm98_vm0, %v47_v3  ;;  %75 = vperm.xlu0 %959, %v53_v12   ;;  %v1185_v34 = vld [vmem:[#allocation2 + $0x38] sm:$0xff]  ;;  %v1187_v35 = vld [vmem:[#allocation2 + $0x30] sm:$0xff]  ;;  %v1191_v36 = vld [vmem:[#allocation2 + $0x28] sm:$0xff] }
  0x19   :  { %839 = vmatprep.subr.msk.mxu0 %vm98_vm0, %v46_v7  ;;  %70 = vperm.xlu1 %960, %v52_v11   ;;  %v1193_v37 = vld [vmem:[#allocation2 + $0x20] sm:$0xff]  ;;  %v1197_v38 = vld [vmem:[#allocation2 + $0x18] sm:$0xff]  ;;  %v1199_v39 = vld [vmem:[#allocation2 + $0x10] sm:$0xff] }
  0x1a   :  { %v1203_v40 = vld [vmem:[#allocation2 + $0x8] sm:$0xff]  ;;  %v454_v41 = vld [vmem:[#allocation2] sm:$0xff] }
  0x1b   :  { %v1209_v42 = vld [vmem:[%s1250_s4] sm:$0x3] }
  0x1c   :  { %840 = vmatpush3.xpose.msk.msra.mxu0 %vm98_vm0, %v46_v7  ;;  %65 = vperm.xlu0 %959, %v51_v14  }
  0x1d   :  { %841 = vmatprep.subr.msk.mxu0 %vm98_vm0, %v45_v10  ;;  %60 = vperm.xlu1 %960, %v50_v4  }
  0x20   :  { %842 = vmatpush3.xpose.msk.msra.mxu0 %vm98_vm0, %v45_v10  ;;  %961 = vset.pattern.permute.xlu0 %v991_v28 }
  0x21   :  { %843 = vmatprep.subr.msk.mxu0 %vm98_vm0, %v44_v13  ;;  %962 = vset.pattern.permute.xlu1 %v991_v28 }
  0x22   :  { %316 = vperm.xlu1 %962, %v1146_v26   ;;  %321 = vperm.xlu0 %961, %v1151_v27  }
  0x24   :  { %844 = vmatpush3.xpose.msk.msra.mxu0 %vm98_vm0, %v44_v13 }
  0x25   :  { %845 = vmatprep.subr.msk.mxu0 %vm98_vm0, %v43_v15 }
  0x26   :  { %311 = vperm.xlu1 %962, %v1163_v30   ;;  %306 = vperm.xlu0 %961, %v1158_v29  }
  0x28   :  { %846 = vmatpush3.xpose.msk.msra.mxu0 %vm98_vm0, %v43_v15 }
  0x29   :  { %847 = vmatprep.subr.msk.mxu0 %vm98_vm0, %v42_v16 }
  0x2a   :  { %301 = vperm.xlu1 %962, %v1175_v32   ;;  %296 = vperm.xlu0 %961, %v1170_v31  }
  0x2c   :  { %848 = vmatpush3.xpose.msk.msra.mxu0 %vm98_vm0, %v42_v16 }
  0x2d   :  { %849 = vmatprep.subr.msk.mxu0 %vm98_vm0, %v41_v17 }
  0x2e   :  { %291 = vperm.xlu1 %962, %v1182_v33   ;;  %286 = vperm.xlu0 %961, %v276_v25  }
  0x30   :  { %850 = vmatpush3.xpose.msk.msra.mxu0 %vm98_vm0, %v41_v17 }
  0x31   :  { %851 = vmatprep.subr.msk.mxu0 %vm98_vm0, %v40_v18 }
  0x32   :  { %499 = vperm.xlu1 %962, %v1185_v34   ;;  %494 = vperm.xlu0 %961, %v1187_v35  }
  0x34   :  { %852 = vmatpush3.xpose.msk.msra.mxu0 %vm98_vm0, %v40_v18 }
  0x35   :  { %853 = vmatprep.subr.msk.mxu0 %vm98_vm0, %v39_v19 }
  0x36   :  { %489 = vperm.xlu1 %962, %v1191_v36   ;;  %484 = vperm.xlu0 %961, %v1193_v37  }
  0x38   :  { %854 = vmatpush3.xpose.msk.msra.mxu0 %vm98_vm0, %v39_v19 }
  0x39   :  { %855 = vmatprep.subr.msk.mxu0 %vm98_vm0, %v38_v20 }
  0x3a   :  { %479 = vperm.xlu1 %962, %v1197_v38   ;;  %474 = vperm.xlu0 %961, %v1199_v39  }
  0x3c   :  { %856 = vmatpush3.xpose.msk.msra.mxu0 %vm98_vm0, %v38_v20 }
  0x3d   :  { %857 = vmatprep.subr.msk.mxu0 %vm98_vm0, %v37_v21 }
  0x3e   :  { %469 = vperm.xlu1 %962, %v1203_v40   ;;  %464 = vperm.xlu0 %961, %v454_v41  }
  0x40   :  { %858 = vmatpush3.xpose.msk.msra.mxu0 %vm98_vm0, %v37_v21 }
  0x41   :  { %859 = vmatprep.subr.msk.mxu0 %vm98_vm0, %v36_v22 }
  0x42   :  { %634 = vperm.xlu1 %962, %v1209_v42  }
  0x44   :  { %860 = vmatpush3.xpose.msk.msra.mxu0 %vm98_vm0, %v36_v22 }
  0x45   :  { %861 = vmatprep.subr.msk.mxu0 %vm98_vm0, %v35_v23 }
  0x48   :  { %862 = vmatpush3.xpose.msk.msra.mxu0 %vm98_vm0, %v35_v23 }
  0x49   :  { %863 = vmatprep.subr.msk.mxu0 %vm98_vm0, %v34_v24 }
  0x4c   :  { %864 = vmatpush3.xpose.msk.msra.mxu0 %vm98_vm0, %v34_v24 }
  0x4f   :  { %866 = vmatmul.mubr.msk.f32.vlgmr.msra.gmra.mxu0 %vm98_vm0, %v51_v14 }
  0x50   :  { %868 = vmatprep.mubr.msk.f32.mxu0 %vm98_vm0, %v52_v11 }
  0x53   :  { %869 = vmatmul.mubr.msk.f32.gmra.mxu0 %vm98_vm0, %v53_v12 }
  0x54   :  { %871 = vmatprep.mubr.msk.f32.mxu0 %vm98_vm0, %v54_v8 }
  0x57   :  { %872 = vmatmul.mubr.msk.f32.gmra.mxu0 %vm98_vm0, %v55_v5 }
  0x58   :  { %874 = vmatprep.mubr.msk.f32.mxu0 %vm98_vm0, %v56_v9 }
  0x5b   :  { %875 = vmatmul.mubr.msk.f32.gmra.mxu0 %vm98_vm0, %v57_v6 }
  0x8b   :  { %v96_v44 = vpop.permute.xlu0 %95 }
  0x8c   :  { %v86_v46 = vpop.permute.xlu1 %85 }
  0x8f   :  { %v91_v49 = vpop.permute.xlu0 %90 }
  0x90   :  { %v81_v51 = vpop.permute.xlu1 %80 }
  0x93   :  { %v76_v55 = vpop.permute.xlu0 %75 }
  0x94   :  { %v71_v60 = vpop.permute.xlu1 %70 }
  0x97   :  { %v66_v1 = vpop.permute.xlu0 %65 }
  0x98   :  { %v61_v4 = vpop.permute.xlu1 %60 }
  0x9d   :  { %v317_v13 = vpop.permute.xlu1 %316  ;;  %v322_v15 = vpop.permute.xlu0 %321 }
  0xa1   :  { %v312_v18 = vpop.permute.xlu1 %311  ;;  %v307_v20 = vpop.permute.xlu0 %306 }
  0xa5   :  { %v302_v28 = vpop.permute.xlu1 %301 }
 0x10f   :  { %v867_v43 = vpop.f32.mrf.mxu0 }
 0x110   :  { %v235_v5 = vadd.f32 %v867_v43, %v66_v1  ;;  %v292_v43 = vpop.permute.xlu1 %291 }
 0x111   :  { %v229_v45 = vpop.f32.mrf.mxu0 }
 0x112   :  { %v230_v7 = vadd.f32 %v229_v45, %v61_v4  ;;  %v269_v9 = vmax.f32 %v235_v5, 0.0 }
 0x113   :  { %v870_v47 = vpop.f32.mrf.mxu0 }
 0x114   :  { %v245_v63 = vadd.f32 %v870_v47, %v76_v55  ;;  %v268_v10 = vmax.f32 %v230_v7, 0.0 }
 0x115   :  { %v239_v48 = vpop.f32.mrf.mxu0 }
 0x116   :  { %v240_v2 = vadd.f32 %v239_v48, %v71_v60  ;;  %v271_v6 = vmax.f32 %v245_v63, 0.0 }
 0x117   :  { %v873_v50 = vpop.f32.mrf.mxu0 }
 0x118   :  { %v255_v57 = vadd.f32 %v873_v50, %v86_v46  ;;  %v270_v8 = vmax.f32 %v240_v2, 0.0 }
 0x119   :  { %v249_v52 = vpop.f32.mrf.mxu0 }
 0x11a   :  { %v250_v61 = vadd.f32 %v249_v52, %v81_v51  ;;  %v273_v0 = vmax.f32 %v255_v57, 0.0  ;;  %v992_v51 = vmov 0.0   ;;  %v500_v52 = vpop.permute.xlu1 %499 }
 0x11b   :  { %v876_v53 = vpop.f32.mrf.mxu0 }
 0x11c   :  { %v265_v54 = vadd.f32 %v876_v53, %v96_v44  ;;  %v272_v3 = vmax.f32 %v250_v61, 0.0 }
 0x11d   :  { %v259_v56 = vpop.f32.mrf.mxu0 }
 0x11e   :  { %v275_v58 = vmax.f32 %v265_v54, 0.0  ;;  %v260_v59 = vadd.f32 %v259_v56, %v91_v49  ;;  %v490_v55 = vpop.permute.xlu1 %489 }
 0x120   :  { %v274_v62 = vmax.f32 %v260_v59, 0.0  ;;  %877 = vmatprep.subr.mxu1 %v275_v58 }
 0x121   :  { %878 = vmatpush3.msra.mxu1 %v275_v58 }
 0x122   :  { %879 = vmatprep.subr.mxu1 %v274_v62  ;;  %v480_v61 = vpop.permute.xlu1 %479 }
 0x123   :  { %880 = vmatpush3.msra.mxu1 %v274_v62 }
 0x124   :  { %881 = vmatprep.subr.mxu1 %v273_v0 }
 0x125   :  { %882 = vmatpush3.msra.mxu1 %v273_v0 }
 0x126   :  { %883 = vmatprep.subr.mxu1 %v272_v3  ;;  %v470_v5 = vpop.permute.xlu1 %469 }
 0x127   :  { %884 = vmatpush3.msra.mxu1 %v272_v3 }
 0x128   :  { %885 = vmatprep.subr.mxu1 %v271_v6 }
 0x129   :  { %886 = vmatpush3.msra.mxu1 %v271_v6 }
 0x12a   :  { %887 = vmatprep.subr.mxu1 %v270_v8 }
 0x12b   :  { %888 = vmatpush3.msra.mxu1 %v270_v8 }
 0x12c   :  { %889 = vmatprep.subr.mxu1 %v269_v9 }
 0x12d   :  { %890 = vmatpush3.msra.mxu1 %v269_v9 }
 0x12e   :  { %891 = vmatprep.subr.mxu1 %v268_v10 }
 0x12f   :  { %892 = vmatpush3.msra.mxu1 %v268_v10 }
 0x130   :  { %894 = vmatmul.mubr.msk.f32.vlgmr.msra.gmra.mxu1 %vm324_vm1, %v1182_v33 }
 0x131   :  { %896 = vmatprep.mubr.msk.f32.mxu1 %vm324_vm1, %v1170_v31 }
 0x134   :  { %897 = vmatmul.mubr.msk.f32.gmra.mxu1 %vm324_vm1, %v1175_v32 }
 0x135   :  { %899 = vmatprep.mubr.msk.f32.mxu1 %vm324_vm1, %v1158_v29 }
 0x138   :  { %900 = vmatmul.mubr.msk.f32.gmra.mxu1 %vm324_vm1, %v1163_v30  ;;  %v297_v30 = vpop.permute.xlu0 %296 }
 0x139   :  { %902 = vmatprep.mubr.msk.f32.mxu1 %vm324_vm1, %v1146_v26 }
 0x13c   :  { %903 = vmatmul.mubr.msk.f32.gmra.mxu1 %vm324_vm1, %v1151_v27  ;;  %v287_v46 = vpop.permute.xlu0 %286 }
 0x13d   :  { %921 = vmatprep.mubr.msk.f32.mxu1 %vm324_vm1, %v454_v41 }
 0x140   :  { %v495_v53 = vpop.permute.xlu0 %494 }
 0x1f0   :  { %v895_v11 = vpop.f32.mrf.mxu1 }
 0x1f1   :  { %v413_v44 = vadd.f32 %v895_v11, %v292_v43 }
 0x1f2   :  { %v407_v12 = vpop.f32.mrf.mxu1 }
 0x1f3   :  { %v408_v47 = vadd.f32 %v407_v12, %v287_v46  ;;  %v447_v49 = vmax.f32 %v413_v44, 0.0 }
 0x1f4   :  { %v898_v14 = vpop.f32.mrf.mxu1 }
 0x1f5   :  { %v423_v31 = vadd.f32 %v898_v14, %v302_v28  ;;  %v446_v50 = vmax.f32 %v408_v47, 0.0 }
 0x1f6   :  { %v417_v16 = vpop.f32.mrf.mxu1 }
 0x1f7   :  { %v418_v33 = vadd.f32 %v417_v16, %v297_v30  ;;  %v449_v45 = vmax.f32 %v423_v31, 0.0 }
 0x1f8   :  { %v901_v17 = vpop.f32.mrf.mxu1 }
 0x1f9   :  { %v433_v24 = vadd.f32 %v901_v17, %v312_v18  ;;  %v448_v48 = vmax.f32 %v418_v33, 0.0 }
 0x1fa   :  { %v427_v19 = vpop.f32.mrf.mxu1 }
 0x1fb   :  { %v428_v27 = vadd.f32 %v427_v19, %v307_v20  ;;  %v451_v32 = vmax.f32 %v433_v24, 0.0 }
 0x1fc   :  { %v904_v21 = vpop.f32.mrf.mxu1 }
 0x1fd   :  { %v443_v22 = vadd.f32 %v904_v21, %v322_v15  ;;  %v450_v41 = vmax.f32 %v428_v27, 0.0 }
 0x1fe   :  { %v437_v23 = vpop.f32.mrf.mxu1 }
 0x1ff   :  { %v453_v25 = vmax.f32 %v443_v22, 0.0  ;;  %v438_v26 = vadd.f32 %v437_v23, %v317_v13  ;;  %v635_v13 = vpop.permute.xlu1 %634 }
 0x201   :  { %v452_v29 = vmax.f32 %v438_v26, 0.0  ;;  %905 = vmatprep.subr.mxu1 %v453_v25 }
 0x202   :  { %906 = vmatpush3.msra.mxu1 %v453_v25 }
 0x203   :  { %907 = vmatprep.subr.mxu1 %v452_v29 }
 0x204   :  { %908 = vmatpush3.msra.mxu1 %v452_v29 }
 0x205   :  { %909 = vmatprep.subr.mxu1 %v451_v32 }
 0x206   :  { %910 = vmatpush3.msra.mxu1 %v451_v32 }
 0x207   :  { %911 = vmatprep.subr.mxu1 %v450_v41 }
 0x208   :  { %912 = vmatpush3.msra.mxu1 %v450_v41 }
 0x209   :  { %913 = vmatprep.subr.mxu1 %v449_v45 }
 0x20a   :  { %914 = vmatpush3.msra.mxu1 %v449_v45 }
 0x20b   :  { %915 = vmatprep.subr.mxu1 %v448_v48 }
 0x20c   :  { %916 = vmatpush3.msra.mxu1 %v448_v48 }
 0x20d   :  { %917 = vmatprep.subr.mxu1 %v447_v49 }
 0x20e   :  { %918 = vmatpush3.msra.mxu1 %v447_v49 }
 0x20f   :  { %919 = vmatprep.subr.mxu1 %v446_v50 }
 0x210   :  { %920 = vmatpush3.msra.mxu1 %v446_v50 }
 0x211   :  { %922 = vmatmul.mubr.msk.f32.vlgmr.msra.gmra.mxu1 %vm324_vm1, %v1203_v40  ;;  %933 = vmatprep.subr.mxu1 %v992_v51 }
 0x212   :  { %924 = vmatprep.mubr.msk.f32.mxu1 %vm324_vm1, %v1199_v39 }
 0x215   :  { %925 = vmatmul.mubr.msk.f32.gmra.mxu1 %vm324_vm1, %v1197_v38 }
 0x216   :  { %927 = vmatprep.mubr.msk.f32.mxu1 %vm324_vm1, %v1193_v37 }
 0x219   :  { %928 = vmatmul.mubr.msk.f32.gmra.mxu1 %vm324_vm1, %v1191_v36  ;;  %v485_v36 = vpop.permute.xlu0 %484 }
 0x21a   :  { %930 = vmatprep.mubr.msk.f32.mxu1 %vm324_vm1, %v1187_v35 }
 0x21d   :  { %931 = vmatmul.mubr.msk.f32.gmra.mxu1 %vm324_vm1, %v1185_v34  ;;  %v475_v0 = vpop.permute.xlu0 %474 }
 0x21e   :  { %949 = vmatprep.mubr.msk.f32.mxu1 %vm993_vm2, %v992_v51 }
 0x221   :  { %v465_v8 = vpop.permute.xlu0 %464 }
 0x2d1   :  { %v923_v39 = vpop.f32.mrf.mxu1 }
 0x2d2   :  { %v590_v6 = vadd.f32 %v923_v39, %v470_v5 }
 0x2d3   :  { %v584_v40 = vpop.f32.mrf.mxu1 }
 0x2d4   :  { %v585_v9 = vadd.f32 %v584_v40, %v465_v8  ;;  %v624_v11 = vmax.f32 %v590_v6, 0.0 }
 0x2d5   :  { %v926_v38 = vpop.f32.mrf.mxu1 }
 0x2d6   :  { %v600_v1 = vadd.f32 %v926_v38, %v480_v61  ;;  %v623_v12 = vmax.f32 %v585_v9, 0.0 }
 0x2d7   :  { %v594_v54 = vpop.f32.mrf.mxu1 }
 0x2d8   :  { %v595_v3 = vadd.f32 %v594_v54, %v475_v0  ;;  %v626_v7 = vmax.f32 %v600_v1, 0.0 }
 0x2d9   :  { %v929_v37 = vpop.f32.mrf.mxu1 }
 0x2da   :  { %v610_v59 = vadd.f32 %v929_v37, %v490_v55  ;;  %v625_v10 = vmax.f32 %v595_v3, 0.0 }
 0x2db   :  { %v604_v56 = vpop.f32.mrf.mxu1 }
 0x2dc   :  { %v605_v62 = vadd.f32 %v604_v56, %v485_v36  ;;  %v628_v2 = vmax.f32 %v610_v59, 0.0 }
 0x2dd   :  { %v932_v57 = vpop.f32.mrf.mxu1 }
 0x2de   :  { %v620_v58 = vadd.f32 %v932_v57, %v500_v52  ;;  %v627_v4 = vmax.f32 %v605_v62, 0.0 }
 0x2df   :  { %v614_v35 = vpop.f32.mrf.mxu1 }
 0x2e0   :  { %v630_v60 = vmax.f32 %v620_v58, 0.0  ;;  %v615_v34 = vadd.f32 %v614_v35, %v495_v53 }
 0x2e2   :  { %v629_v63 = vmax.f32 %v615_v34, 0.0  ;;  %934 = vmatpush3.msra.mxu1 %v630_v60 }
 0x2e3   :  { %935 = vmatprep.subr.mxu1 %v992_v51 }
 0x2e4   :  { %936 = vmatpush3.msra.mxu1 %v629_v63 }
 0x2e5   :  { %937 = vmatprep.subr.mxu1 %v992_v51 }
 0x2e6   :  { %938 = vmatpush3.msra.mxu1 %v628_v2 }
 0x2e7   :  { %939 = vmatprep.subr.mxu1 %v992_v51 }
 0x2e8   :  { %940 = vmatpush3.msra.mxu1 %v627_v4 }
 0x2e9   :  { %941 = vmatprep.subr.mxu1 %v992_v51 }
 0x2ea   :  { %942 = vmatpush3.msra.mxu1 %v626_v7 }
 0x2eb   :  { %943 = vmatprep.subr.mxu1 %v992_v51 }
 0x2ec   :  { %944 = vmatpush3.msra.mxu1 %v625_v10 }
 0x2ed   :  { %945 = vmatprep.subr.mxu1 %v992_v51 }
 0x2ee   :  { %946 = vmatpush3.msra.mxu1 %v624_v11 }
 0x2ef   :  { %947 = vmatprep.subr.mxu1 %v992_v51 }
 0x2f0   :  { %948 = vmatpush3.msra.mxu1 %v623_v12 }
 0x2f1   :  { %950 = vmatmul.mubr.msk.f32.vlgmr.msra.gmra.mxu1 %vm324_vm1, %v1209_v42 }
 0x3b1   :  { %v705_v14 = vpop.f32.mrf.mxu1 }
 0x3b2   :  { %v706_v15 = vadd.f32 %v705_v14, %v635_v13 }
 0x3b3   :  { %v951_v16 = vpop.f32.mrf.mxu1 }
 0x3b4   :  { %v709_v17 = vmul.f32 %v706_v15, %v706_v15 }
 0x3b6   :  { %v711_v18 = vsel %vm710_vm3, %v709_v17, 0.0 }
 0x3b7   :  { %v712_v19 = vrot.slane %v711_v18, 4 }
 0x3b9   :  { %v713_v20 = vadd.f32 %v712_v19, %v711_v18 }
 0x3bb   :  { %v714_v21 = vrot.slane %v713_v20, 2 }
 0x3bd   :  { %v715_v22 = vadd.f32 %v714_v21, %v713_v20 }
 0x3bf   :  { %v716_v23 = vrot.slane %v715_v22, 1 }
 0x3c1   :  { %v717_v24 = vadd.f32 %v716_v23, %v715_v22 }
 0x3c3   :  { %v718_v25 = vmax.f32 %v717_v24, 1e-24 }
 0x3c5   :  { %963 = vrsqrt.f32 %v718_v25 }
 0x3d2   :  { %v964_v26 = vpop.eup %963 }
 0x3d3   :  { %v720_v28 = vmul.f32 %v964_v26, %v706_v15 }
 0x3d5   :  { %721 = vst [vmem:[%s1251_s5] sm:$0x3] %v720_v28 }
 0x3d6   :  { %726 = vsyncpa [#allocation3], 1 }

</bundles_post_ra>
